<compile_context>
chip_gen: v6e
topology: v6e:2x2x1
jax: 0.10.0
libtpu: 0.0.40
codegen_flags: <defaults>
</compile_context>

<pallas_src>
import functools

import jax
import jax.numpy as jnp
from jax import lax
from jax.experimental import pallas as pl
from jax.experimental.pallas import tpu as pltpu


# --------------------------------------------------------------------------
# small helpers
# --------------------------------------------------------------------------
def _round_up(x, m):
    return (x + m - 1) // m * m


def _tile(dim, preferred, align):
    """Pick a tile that is a multiple of `align`, divides the padded dim and
    is as close to `preferred` as possible (minimal zero padding)."""
    padded = _round_up(dim, align)
    t = preferred
    while t > align and padded % t:
        t -= align
    return t, padded


def _pad2(a, shape):
    pads = [(0, t - s) for s, t in zip(a.shape, shape)]
    if all(p == (0, 0) for p in pads):
        return a
    return jnp.pad(a, pads)


# --------------------------------------------------------------------------
# Pallas kernels
# --------------------------------------------------------------------------
def _linear_kernel(x_ref, w_ref, b_ref, o_ref, acc_ref, *, dims):
    """One (i, j, k) step of the tiled matmul  y = x @ W^T + b  (or x @ W)."""
    @pl.when(pl.program_id(2) == 0)
    def _():
        acc_ref[...] = jnp.zeros_like(acc_ref)

    acc_ref[...] += lax.dot_general(
        x_ref[...], w_ref[...],
        dimension_numbers=dims,
        preferred_element_type=jnp.float32,
    )

    @pl.when(pl.program_id(2) == pl.num_programs(2) - 1)
    def _():
        o_ref[...] = (acc_ref[...] + b_ref[...]).astype(o_ref.dtype)


def _bjorck_fused_kernel(w_ref, w_out_ref, delta_ref, *, iters, thres, tall):
    """All order-1 Björck iterations fused; W stays VMEM/vreg resident (one
    load before the loop, one store after)."""
    w0 = w_ref[...]

    def body(_, carry):
        w, delta = carry          # delta: (1,1) f32, max|dW| of last APPLIED step
        if tall:
            # gram = W^T W   (contract dim 0 of both operands; no W^T copy)
            gram = lax.dot_general(w, w, (((0,), (0,)), ((), ())),
                                   preferred_element_type=jnp.float32)
            upd = lax.dot_general(w, gram, (((1,), (0,)), ((), ())),
                                  preferred_element_type=jnp.float32)
        else:
            # wide matrix: gram = W W^T,   W_new = 1.5 W - 0.5 (W W^T) W
            gram = lax.dot_general(w, w, (((1,), (1,)), ((), ())),
                                   preferred_element_type=jnp.float32)
            upd = lax.dot_general(gram, w, (((1,), (0,)), ((), ())),
                                  preferred_element_type=jnp.float32)
        w_new = 1.5 * w - 0.5 * upd

        step_delta = jnp.max(jnp.abs(w_new - w)).reshape(1, 1)
        keep = delta >= thres                    # (1,1) bool: still iterating?
        gate = keep.astype(jnp.float32)          # vector-domain freeze mask
        # TODO(synk): a true early-exit (skipping the remaining matmuls) needs a
        # scalar-domain predicate; the freeze below is semantically identical.
        w_next = w + gate * (w_new - w)
        delta_next = jnp.where(keep, step_delta, delta)
        return w_next, delta_next

    w_fin, delta = lax.fori_loop(
        0, iters, body, (w0, jnp.full((1, 1), jnp.inf, jnp.float32)))
    w_out_ref[...] = w_fin
    delta_ref[...] = delta


# --------------------------------------------------------------------------
# Wrappers around pallas_call
# --------------------------------------------------------------------------
@functools.partial(jax.jit, static_argnames=("transpose_weight", "compute_dtype"))
def pallas_linear(x, w, bias=None, *, transpose_weight=True, compute_dtype=None):
    """transpose_weight=True : y = x @ w^T + bias   (torch F.linear, w:[N,K])
       transpose_weight=False: y = x @ w   + bias   (w:[K,N])"""
    M, K = x.shape
    if transpose_weight:
        N, Kw = w.shape
    else:
        Kw, N = w.shape
    assert K == Kw, "contraction dims mismatch"
    out_dtype = x.dtype
    if compute_dtype is None:
        compute_dtype = x.dtype

    # tiles + padded dims: last dim lane-dense (128), sublane dim multiple of 8
    tm, M_pad = _tile(M, 256, 8)
    tn, N_pad = _tile(N, 256, 128)
    tk, K_pad = _tile(K, 512, 128)

    # cast ONCE in the wrapper (not per grid step in the kernel): halves HBM
    # traffic / VMEM tile footprint when compute_dtype is bf16.
    x_p = _pad2(x, (M_pad, K_pad)).astype(compute_dtype)
    if transpose_weight:
        w_p = _pad2(w, (N_pad, K_pad)).astype(compute_dtype)
        w_spec = pl.BlockSpec((tn, tk), lambda i, j, k: (j, k))
        dims = (((1,), (1,)), ((), ()))           # contract last dims (x @ W^T)
    else:
        w_p = _pad2(w, (K_pad, N_pad)).astype(compute_dtype)
        w_spec = pl.BlockSpec((tk, tn), lambda i, j, k: (k, j))
        dims = (((1,), (0,)), ((), ()))           # standard x @ W

    if bias is None:
        b_p = jnp.zeros((1, N_pad), jnp.float32)
    else:
        b_p = _pad2(bias.reshape(1, N).astype(jnp.float32), (1, N_pad))

    grid = (M_pad // tm, N_pad // tn, K_pad // tk)
    flops = 2 * M_pad * N_pad * K_pad
    bytes_accessed = int(
        x_p.size * x_p.dtype.itemsize + w_p.size * w_p.dtype.itemsize
        + b_p.size * 4 + M_pad * N_pad * jnp.dtype(out_dtype).itemsize)

    y = pl.pallas_call(
        functools.partial(_linear_kernel, dims=dims),
        out_shape=jax.ShapeDtypeStruct((M_pad, N_pad), out_dtype),
        grid=grid,
        in_specs=[
            pl.BlockSpec((tm, tk), lambda i, j, k: (i, k)),
            w_spec,
            pl.BlockSpec((1, tn), lambda i, j, k: (0, j)),
        ],
        out_specs=pl.BlockSpec((tm, tn), lambda i, j, k: (i, j)),
        scratch_shapes=[pltpu.VMEM((tm, tn), jnp.float32)],
        compiler_params=pltpu.CompilerParams(
            dimension_semantics=("parallel", "parallel", "arbitrary")),
        cost_estimate=pl.CostEstimate(flops=flops, transcendentals=0,
                                      bytes_accessed=bytes_accessed),
    )(x_p, w_p, b_p)
    return y[:M, :N]


@functools.partial(jax.jit, static_argnames=("order", "iters", "thres"))
def bjorck_orthonormalize(w, order=1, iters=10, thres=1e-6):
    """Order-1 Björck orthonormalization, fully fused into a single kernel."""
    if order != 1:
        # TODO(synk): only the order=1 Taylor expansion (module default) is implemented.
        raise NotImplementedError("only order=1 Björck orthonormalization is supported")

    R, C = w.shape
    tall = R >= C
    R_pad, C_pad = _round_up(R, 8), _round_up(C, 128)
    w_p = _pad2(w.astype(jnp.float32), (R_pad, C_pad))

    gram_dim = C_pad if tall else R_pad
    vmem_est = 4 * (3 * R_pad * C_pad + gram_dim * gram_dim)
    vmem_limit = None
    if vmem_est > 16 * 1024 * 1024:
        # TODO(synk): very large feature counts need an in-kernel emit_pipeline over
        # the contraction dim instead of a fully VMEM-resident W / gram matrix.
        vmem_limit = int(min(2 * vmem_est, 48 * 1024 * 1024))

    w_new, delta = pl.pallas_call(
        functools.partial(_bjorck_fused_kernel,
                          iters=int(iters), thres=float(thres), tall=bool(tall)),
        out_shape=(jax.ShapeDtypeStruct((R_pad, C_pad), jnp.float32),
                   jax.ShapeDtypeStruct((1, 1), jnp.float32)),
        grid=(1,),
        in_specs=[pl.BlockSpec((R_pad, C_pad), lambda i: (0, 0))],
        out_specs=(pl.BlockSpec((R_pad, C_pad), lambda i: (0, 0)),
                   pl.BlockSpec((1, 1), lambda i: (0, 0))),
        input_output_aliases={0: 0},   # update W in place (HBM buffer reuse)
        compiler_params=pltpu.CompilerParams(
            dimension_semantics=("arbitrary",), vmem_limit_bytes=vmem_limit),
        cost_estimate=pl.CostEstimate(
            flops=4 * int(iters) * R_pad * C_pad * gram_dim,
            transcendentals=0,
            bytes_accessed=2 * R_pad * C_pad * 4),
    )(w_p)

    return w_new[:R, :C].astype(w.dtype), delta[0, 0]


# --------------------------------------------------------------------------
# BjorckLinear module
# --------------------------------------------------------------------------
class BjorckLinearPallas:
    def __init__(self, in_features, out_features, bias=False,
                 init="permutation", order=1, iters=10, thres=1e-6,
                 compute_dtype=None, key=None):
        self.in_features = in_features
        self.out_features = out_features
        self.order = order
        self.iters = iters
        self.thres = thres
        # compute_dtype=jnp.bfloat16 runs the forward matmul at native MXU rate
        # (f32 accumulation); None keeps the input dtype (exact f32 path).
        self.compute_dtype = compute_dtype

        if init not in ("identical", "reverse", "permutation"):
            raise ValueError("The initialization method %s is not supported." % init)
        if key is None:
            key = jax.random.PRNGKey(0)

        max_f = max(out_features, in_features)
        min_f = min(out_features, in_features)
        perm = jax.random.permutation(key, max_f)[:min_f]
        if init == "identical":
            perm = jnp.sort(perm)
        elif init == "reverse":
            perm = jnp.sort(perm)[::-1]

        matrix = jnp.zeros((out_features, in_features), dtype=jnp.float32)
        eye = jnp.eye(min_f, dtype=jnp.float32)
        if out_features < in_features:
            matrix = matrix.at[:, perm].set(eye)   # row-orthogonal
        else:
            matrix = matrix.at[perm, :].set(eye)   # column-orthogonal
        self.weight = matrix                       # [out_features, in_features]
        self.bias = jnp.zeros((out_features,), dtype=jnp.float32) if bias else None
        self.training = True
        self._last_projection_delta = None         # device scalar, never synced

    def _project(self):
        self.weight, self._last_projection_delta = bjorck_orthonormalize(
            self.weight, order=self.order, iters=self.iters, thres=self.thres)

    def forward(self, inputs, projection=True, inverse=False):
        if self.training and projection:
            self._project()
        if not inverse:
            # F.linear(x, W, b) = x @ W^T + b
            return pallas_linear(inputs, self.weight, self.bias,
                                 transpose_weight=True,
                                 compute_dtype=self.compute_dtype)
        # inverse: F.linear(x - b, W^T) = (x - b) @ W
        x = inputs - self.bias if self.bias is not None else inputs
        return pallas_linear(x, self.weight, None,
                             transpose_weight=False,
                             compute_dtype=self.compute_dtype)

    __call__ = forward


# --------------------------------------------------------------------------
if __name__ == "__main__":
    key = jax.random.PRNGKey(0)
    k_w, k_x, k_r = jax.random.split(key, 3)

    batch, in_features, out_features = 8, 32, 48
    layer = BjorckLinearPallas(in_features, out_features, bias=False,
                               init="permutation", order=1, iters=10,
                               thres=1e-6, key=k_w)

    x = jax.random.normal(k_x, (batch, in_features), dtype=jnp.float32)

    # forward (projection runs the fused Björck kernel and updates the weight)
    y = jax.block_until_ready(layer(x, projection=True, inverse=False))
    w_proj = layer.weight
    y_ref = jnp.matmul(x, w_proj.T, precision=lax.Precision.HIGHEST)
    assert y.shape == (batch, out_features)
    assert jnp.allclose(y, y_ref, atol=1e-5), "forward mismatch vs reference"

    # inverse path: (no bias) y @ W
    x_rec = jax.block_until_ready(layer(y, projection=False, inverse=True))
    x_rec_ref = jnp.matmul(y, w_proj, precision=lax.Precision.HIGHEST)
    assert x_rec.shape == (batch, in_features)
    assert jnp.allclose(x_rec, x_rec_ref, atol=1e-5), "inverse mismatch vs reference"

    # fused Björck kernel vs pure-JAX reference on a non-orthogonal matrix
    w_raw = jax.random.normal(k_r, (out_features, in_features), dtype=jnp.float32)
    w0 = 0.9 * w_raw / (jnp.sqrt(float(out_features)) + jnp.sqrt(float(in_features)))
    w_bj, _ = bjorck_orthonormalize(w0, order=1, iters=10, thres=1e-6)
    w_bj = jax.block_until_ready(w_bj)

    def bjorck_ref(w, iters, thres):
        for _ in range(iters):
            if w.shape[0] >= w.shape[1]:
                g = jnp.matmul(w.T, w, precision=lax.Precision.HIGHEST)
                w_new = 1.5 * w - 0.5 * jnp.matmul(w, g, precision=lax.Precision.HIGHEST)
            else:
                g = jnp.matmul(w, w.T, precision=lax.Precision.HIGHEST)
                w_new = 1.5 * w - 0.5 * jnp.matmul(g, w, precision=lax.Precision.HIGHEST)
            d = float(jnp.max(jnp.abs(w_new - w)))
            w = w_new
            if d < thres:
                break
        return w

    w_bj_ref = bjorck_ref(w0, 10, 1e-6)
    assert jnp.allclose(w_bj, w_bj_ref, atol=2e-3), "Bjorck mismatch vs reference"
    gram = jnp.matmul(w_bj.T, w_bj, precision=lax.Precision.HIGHEST)
    assert jnp.allclose(gram, jnp.eye(in_features), atol=2e-3), "result not orthonormal"

    # bf16 MXU operand path (native matmul dtype on v5e/v6e/v7x), loose tolerance
    y_bf16 = jax.block_until_ready(
        pallas_linear(x, w_proj, None, transpose_weight=True,
                      compute_dtype=jnp.bfloat16))
    assert jnp.allclose(y_bf16, y_ref, atol=5e-2), "bf16 path mismatch vs reference"

    print("KERNEL_OK")
</pallas_src>

<mosaic_0001>
module attributes {stable_mosaic.version = 11 : i64} {
  func.func @_bjorck_fused_kernel(%arg0: i32, %arg1: memref<48x128xf32, #tpu.memory_space<vmem>>, %arg2: memref<48x128xf32, #tpu.memory_space<vmem>>, %arg3: memref<1x1xf32, #tpu.memory_space<vmem>>) attributes {dimension_semantics = [#tpu.dimension_semantics<arbitrary>], iteration_bounds = array<i64: 1>, scalar_prefetch = 0 : i64, scratch_operands = 0 : i64, tpu.core_type = #tpu.core_type<tc>, window_params = [{pipeline_mode = #tpu.pipeline_mode<synchronous>, transform_indices = @transform_0, window_bounds = array<i64: 48, 128>}, {pipeline_mode = #tpu.pipeline_mode<synchronous>, transform_indices = @transform_1, window_bounds = array<i64: 48, 128>}, {pipeline_mode = #tpu.pipeline_mode<synchronous>, transform_indices = @transform_2, window_bounds = array<i64: 1, 1>}]} {
    %c0 = arith.constant 0 : index
    %c0_0 = arith.constant 0 : index
    %0 = vector.load %arg1[%c0, %c0_0] : memref<48x128xf32, #tpu.memory_space<vmem>>, vector<48x128xf32>
    %cst = arith.constant 0x7F800000 : f32
    %1 = vector.broadcast %cst : f32 to vector<1x1xf32>
    %c0_i32 = arith.constant 0 : i32
    %c10_i32 = arith.constant 10 : i32
    %2 = arith.addi %c0_i32, %c10_i32 : i32
    %c1_i32 = arith.constant 1 : i32
    %3:2 = scf.for %arg4 = %c0_i32 to %2 step %c1_i32 iter_args(%arg5 = %0, %arg6 = %1) -> (vector<48x128xf32>, vector<1x1xf32>)  : i32 {
      %cst_5 = arith.constant dense<0.000000e+00> : vector<128x128xf32>
      %6 = tpu.matmul %arg5, %arg5, %cst_5 {dimension_numbers = #tpu.dot_dimension_numbers<[0], [0], [1], [1], [0, 1, 1, 1], [], []>} : vector<48x128xf32>, vector<48x128xf32>, vector<128x128xf32> -> vector<128x128xf32>
      %cst_6 = arith.constant dense<0.000000e+00> : vector<48x128xf32>
      %7 = tpu.matmul %arg5, %6, %cst_6 {dimension_numbers = #tpu.dot_dimension_numbers<[1], [0], [0], [1], [0, 0, 1, 1], [], []>} : vector<48x128xf32>, vector<128x128xf32>, vector<48x128xf32> -> vector<48x128xf32>
      %cst_7 = arith.constant 1.500000e+00 : f32
      %8 = vector.broadcast %cst_7 : f32 to vector<48x128xf32>
      %9 = arith.mulf %8, %arg5 : vector<48x128xf32>
      %cst_8 = arith.constant 5.000000e-01 : f32
      %10 = vector.broadcast %cst_8 : f32 to vector<48x128xf32>
      %11 = arith.mulf %10, %7 : vector<48x128xf32>
      %12 = arith.subf %9, %11 : vector<48x128xf32>
      %13 = arith.subf %12, %arg5 : vector<48x128xf32>
      %14 = math.absf %13 : vector<48x128xf32>
      %15 = vector.shape_cast %14 : vector<48x128xf32> to vector<1x48x128xf32>
      %cst_9 = arith.constant dense<0xFF800000> : vector<1xf32>
      %16 = vector.multi_reduction <maximumf>, %15, %cst_9 [1, 2] : vector<1x48x128xf32> to vector<1xf32>
      %17 = vector.shape_cast %16 : vector<1xf32> to vector<1x1x1xf32>
      %18 = vector.extract %17[0, 0, 0] : f32 from vector<1x1x1xf32>
      %19 = vector.broadcast %18 : f32 to vector<1x1xf32>
      %cst_10 = arith.constant 9.99999997E-7 : f32
      %20 = vector.broadcast %cst_10 : f32 to vector<1x1xf32>
      %21 = arith.cmpf oge, %arg6, %20 : vector<1x1xf32>
      %22 = arith.extui %21 : vector<1x1xi1> to vector<1x1xi32>
      %23 = arith.sitofp %22 : vector<1x1xi32> to vector<1x1xf32>
      %24 = arith.subf %12, %arg5 : vector<48x128xf32>
      %25 = vector.broadcast %23 : vector<1x1xf32> to vector<48x128xf32>
      %26 = arith.mulf %25, %24 : vector<48x128xf32>
      %27 = arith.addf %arg5, %26 : vector<48x128xf32>
      %28 = arith.select %21, %19, %arg6 : vector<1x1xi1>, vector<1x1xf32>
      scf.yield %27, %28 : vector<48x128xf32>, vector<1x1xf32>
    }
    %c0_1 = arith.constant 0 : index
    %c0_2 = arith.constant 0 : index
    %4 = vector.load %arg2[%c0_1, %c0_2] : memref<48x128xf32, #tpu.memory_space<vmem>>, vector<48x128xf32>
    tpu.vector_store %arg2[%c0_1, %c0_2], %3#0 {strides = array<i32>} : memref<48x128xf32, #tpu.memory_space<vmem>>, vector<48x128xf32>,
    %c0_3 = arith.constant 0 : index
    %c0_4 = arith.constant 0 : index
    %5 = vector.load %arg3[%c0_3, %c0_4] : memref<1x1xf32, #tpu.memory_space<vmem>>, vector<1x1xf32>
    tpu.vector_store %arg3[%c0_3, %c0_4], %3#1 {strides = array<i32>} : memref<1x1xf32, #tpu.memory_space<vmem>>, vector<1x1xf32>,
    return
  }
  func.func @transform_0(%arg0: i32) -> (i32, i32) {
    %c0_i32 = arith.constant 0 : i32
    %c0_i32_0 = arith.constant 0 : i32
    %c0_i32_1 = arith.constant 0 : i32
    return %c0_i32, %c0_i32_0 : i32, i32
  }
  func.func @transform_1(%arg0: i32) -> (i32, i32) {
    %c0_i32 = arith.constant 0 : i32
    %c0_i32_0 = arith.constant 0 : i32
    %c0_i32_1 = arith.constant 0 : i32
    return %c0_i32, %c0_i32_0 : i32, i32
  }
  func.func @transform_2(%arg0: i32) -> (i32, i32) {
    %c0_i32 = arith.constant 0 : i32
    %c0_i32_0 = arith.constant 0 : i32
    %c0_i32_1 = arith.constant 0 : i32
    return %c0_i32, %c0_i32_0 : i32, i32
  }
}

</mosaic_0001>

<bundles_post_ra>
// kernel: bjorck_orthonormalize.1
= control target key start
LH: loop header
LB: loop body
LE: loop exit
PB: predicated region body
PF: predicated region fallthrough
CT: control target
= control target key end

     0   :  { %8 = vsyncpa [#allocation3], 0  ;;  %v791_v6 = vmov inf   ;;  %s805_s21 = smov 0   ;;  %s933_s0 = inlined_call_operand.vmem [shape: f32[48,128], index: 0, kind: input, shape index: {}, may-alias: {0,1}]   ;;  %s934_s1 = inlined_call_operand.vmem [shape: f32[48,128], index: 1, kind: output, shape index: {0}, may-alias: {0,1}]   ;;  %s935_s2 = inlined_call_operand.hbm [shape: f32[1,1], index: 2, kind: output, shape index: {1}]  }
   0x1   :  { %v11_v0 = vld [vmem:[%s933_s0] sm:$0xff]   ;;  %v12_v1 = vld [vmem:[%s933_s0 + $0x8] sm:$0xff]   ;;  %v13_v2 = vld [vmem:[%s933_s0 + $0x10] sm:$0xff]  }
   0x2   :  { %v14_v3 = vld [vmem:[%s933_s0 + $0x18] sm:$0xff]   ;;  %v15_v4 = vld [vmem:[%s933_s0 + $0x20] sm:$0xff]   ;;  %v16_v5 = vld [vmem:[%s933_s0 + $0x28] sm:$0xff]  }
   0x3 LB: > { %30 = vxpose.xlu0.b32.start [1/6] (short) %v750_v0, 128  ;;  %593 = vmatprep.mubr.f32.mxu1 %v750_v0  ;;  %vm62_vm0 = vcmask 392192   ;;  %v352_v39 = vmul.f32 1.5, %v746_v1  ;;  %v351_v42 = vmul.f32 1.5, %v750_v0  ;;  %vm396_vm1 = vcmp.ge.f32.partialorder %v726_v6, 1e-06  ;;  %s22_s21 = sadd.s32 1, %s754_s21   ;;  %s754_s21 = sphi %s805_s21, %s22_s21   ;;  %v750_v0 = vphi %v11_v0, %v942_v0   ;;  %v746_v1 = vphi %v12_v1, %v941_v1   ;;  %v742_v2 = vphi %v13_v2, %v940_v2   ;;  %v738_v3 = vphi %v14_v3, %v939_v3   ;;  %v734_v4 = vphi %v15_v4, %v938_v4   ;;  %v730_v5 = vphi %v16_v5, %v937_v5   ;;  %v726_v6 = vphi %v791_v6, %v936_v6  }
   0x4   : > { %525 = vmatprep.subr.mxu0 %v730_v5  ;;  %v354_v46 = vmul.f32 1.5, %v738_v3  ;;  %v756_v48 = vmov 0.0   ;;  %v353_v53 = vmul.f32 1.5, %v742_v2  ;;  %v356_v58 = vmul.f32 1.5, %v730_v5  ;;  %p19_p0 = scmp.ge.s32.totalorder %s22_s21, 10  }
   0x5   : > { %526 = vmatpush3.msra.mxu0 %v730_v5  ;;  %v480_v49 = vsel %vm396_vm1, 1.0, %v756_v48  ;;  %vm418_vm2 = vcmask (%p19_p0), 0   ;;  %s757_s6 = smov (%p19_p0), [#allocation2]  }
   0x6   : > { %527 = vmatprep.subr.mxu0 %v734_v4  ;;  %s428_s7 = sshll.u32 (%p19_p0), %s757_s6, 4  ;;  %s429_s7 = int_to_ptr.vmem [resolvable:$true] %s428_s7 }
   0x7   : > { %31 = vxpose.xlu0.b32.cont [2/6] (short) %v746_v1, 128  ;;  %528 = vmatpush3.msra.mxu0 %v734_v4  ;;  %s670_s8 = scalar_lea.vmem (%p19_p0), %s429_s7, 16  ;;  %s674_s9 = scalar_lea.vmem (%p19_p0), %s429_s7, 32 }
   0x8   : > { %529 = vmatprep.subr.mxu0 %v738_v3  ;;  %p671_p1 = scmp.ne.s32.totalorder (%p19_p0), %s429_s7, %s670_s8  ;;  %p675_p2 = scmp.lt.s32.totalorder (%p19_p0), %s429_s7, %s429_s7 }
   0x9   : > { %530 = vmatpush3.msra.mxu0 %v738_v3  ;;  %p676_p3 = scmp.lt.s32.totalorder (%p19_p0), %s674_s9, %s670_s8 }
   0xa   : > { %531 = vmatprep.subr.mxu0 %v742_v2 }
   0xb   : > { %32 = vxpose.xlu0.b32.cont [3/6] (short) %v742_v2, 128  ;;  %532 = vmatpush3.msra.mxu0 %v742_v2  ;;  %p677_p4 = por (%p19_p0), %p676_p3, %p675_p2 }
   0xc   : > { %533 = vmatprep.subr.mxu0 %v746_v1 }
   0xd   : > { %534 = vmatpush3.msra.mxu0 %v746_v1  ;;  %p678_p5 = pnand (%p19_p0), %p677_p4, %p671_p1 }
   0xe   : > { %535 = vmatprep.subr.mxu0 %v750_v0 }
   0xf   : > { %33 = vxpose.xlu0.b32.cont [4/6] (short) %v738_v3, 128  ;;  %536 = vmatpush3.msra.mxu0 %v750_v0 }
  0x13   : > { %34 = vxpose.xlu0.b32.cont [5/6] (short) %v734_v4, 128 }
  0x17   : > { %35 = vxpose.xlu0.b32.end [6/6] (short) %v730_v5, 128 }
  0x7f   : > { %v46_v7 = vpop.trf.xlu0 }
  0x80   : > { %537 = vmatprep.mubr.msk.f32.mxu0 %vm62_vm0, %v46_v7  ;;  %v355_v7 = vmul.f32 1.5, %v734_v4 }
  0x83   : > { %v47_v8 = vpop.trf.xlu0 }
  0x84   : > { %538 = vmatmul.mubr.msk.f32.vlgmr.msra.gmra.mxu0 %vm62_vm0, %v47_v8 }
  0x87   : > { %v48_v9 = vpop.trf.xlu0 }
  0x88   : > { %540 = vmatprep.mubr.msk.f32.mxu0 %vm62_vm0, %v48_v9 }
  0x8b   : > { %v49_v10 = vpop.trf.xlu0 }
  0x8c   : > { %541 = vmatmul.mubr.msk.f32.gmra.mxu0 %vm62_vm0, %v49_v10 }
  0x8f   : > { %v50_v11 = vpop.trf.xlu0 }
  0x90   : > { %543 = vmatprep.mubr.msk.f32.mxu0 %vm62_vm0, %v50_v11 }
  0x93   : > { %v51_v12 = vpop.trf.xlu0 }
  0x94   : > { %544 = vmatmul.mubr.msk.f32.gmra.mxu0 %vm62_vm0, %v51_v12 }
  0x97   : > { %v52_v13 = vpop.trf.xlu0 }
  0x98   : > { %546 = vmatprep.mubr.msk.f32.mxu0 %vm62_vm0, %v52_v13 }
  0x9b   : > { %v53_v14 = vpop.trf.xlu0 }
  0x9c   : > { %547 = vmatmul.mubr.msk.f32.gmra.mxu0 %vm62_vm0, %v53_v14 }
  0x9f   : > { %v54_v15 = vpop.trf.xlu0 }
  0xa0   : > { %549 = vmatprep.mubr.msk.f32.mxu0 %vm62_vm0, %v54_v15 }
  0xa3   : > { %v55_v16 = vpop.trf.xlu0 }
  0xa4   : > { %550 = vmatmul.mubr.msk.f32.gmra.mxu0 %vm62_vm0, %v55_v16 }
  0xa7   : > { %v56_v17 = vpop.trf.xlu0 }
  0xa8   : > { %552 = vmatprep.mubr.msk.f32.mxu0 %vm62_vm0, %v56_v17 }
  0xab   : > { %v57_v18 = vpop.trf.xlu0 }
  0xac   : > { %553 = vmatmul.mubr.msk.f32.gmra.mxu0 %vm62_vm0, %v57_v18 }
  0xaf   : > { %v58_v19 = vpop.trf.xlu0 }
  0xb0   : > { %555 = vmatprep.mubr.msk.f32.mxu0 %vm62_vm0, %v58_v19 }
  0xb3   : > { %v59_v20 = vpop.trf.xlu0 }
  0xb4   : > { %556 = vmatmul.mubr.msk.f32.gmra.mxu0 %vm62_vm0, %v59_v20 }
  0xb7   : > { %v60_v21 = vpop.trf.xlu0 }
  0xb8   : > { %558 = vmatprep.mubr.msk.f32.mxu0 %vm62_vm0, %v60_v21 }
  0xbb   : > { %v61_v22 = vpop.trf.xlu0 }
  0xbc   : > { %559 = vmatmul.mubr.msk.f32.gmra.mxu0 %vm62_vm0, %v61_v22 }
 0x144   : > { %v539_v23 = vpop.f32.mrf.mxu0 }
 0x146   : > { %v177_v24 = vpop.f32.mrf.mxu0 }
 0x14c   : > { %v542_v25 = vpop.f32.mrf.mxu0 }
 0x14e   : > { %v187_v26 = vpop.f32.mrf.mxu0 }
 0x154   : > { %v545_v27 = vpop.f32.mrf.mxu0 }
 0x156   : > { %v197_v28 = vpop.f32.mrf.mxu0 }
 0x15c   : > { %v548_v29 = vpop.f32.mrf.mxu0 }
 0x15e   : > { %v207_v30 = vpop.f32.mrf.mxu0 }
 0x164   : > { %v551_v31 = vpop.f32.mrf.mxu0 }
 0x166   : > { %v217_v32 = vpop.f32.mrf.mxu0 }
 0x16c   : > { %v554_v33 = vpop.f32.mrf.mxu0 }
 0x16e   : > { %v227_v34 = vpop.f32.mrf.mxu0 }
 0x174   : > { %v557_v35 = vpop.f32.mrf.mxu0 }
 0x176   : > { %v237_v36 = vpop.f32.mrf.mxu0 }
 0x17c   : > { %v560_v37 = vpop.f32.mrf.mxu0 }
 0x17d   : > { %561 = vmatprep.subr.mxu1 %v560_v37 }
 0x17e   : > { %v247_v38 = vpop.f32.mrf.mxu0  ;;  %562 = vmatpush3.msra.mxu1 %v560_v37 }
 0x17f   : > { %563 = vmatprep.subr.mxu1 %v247_v38 }
 0x180   : > { %564 = vmatpush3.msra.mxu1 %v247_v38 }
 0x181   : > { %565 = vmatprep.subr.mxu1 %v557_v35 }
 0x182   : > { %566 = vmatpush3.msra.mxu1 %v557_v35 }
 0x183   : > { %567 = vmatprep.subr.mxu1 %v237_v36 }
 0x184   : > { %568 = vmatpush3.msra.mxu1 %v237_v36 }
 0x185   : > { %569 = vmatprep.subr.mxu1 %v554_v33 }
 0x186   : > { %570 = vmatpush3.msra.mxu1 %v554_v33 }
 0x187   : > { %571 = vmatprep.subr.mxu1 %v227_v34 }
 0x188   : > { %572 = vmatpush3.msra.mxu1 %v227_v34 }
 0x189   : > { %573 = vmatprep.subr.mxu1 %v551_v31 }
 0x18a   : > { %574 = vmatpush3.msra.mxu1 %v551_v31 }
 0x18b   : > { %575 = vmatprep.subr.mxu1 %v217_v32 }
 0x18c   : > { %576 = vmatpush3.msra.mxu1 %v217_v32 }
 0x18d   : > { %577 = vmatprep.subr.mxu1 %v548_v29 }
 0x18e   : > { %578 = vmatpush3.msra.mxu1 %v548_v29 }
 0x18f   : > { %579 = vmatprep.subr.mxu1 %v207_v30 }
 0x190   : > { %580 = vmatpush3.msra.mxu1 %v207_v30 }
 0x191   : > { %581 = vmatprep.subr.mxu1 %v545_v27 }
 0x192   : > { %582 = vmatpush3.msra.mxu1 %v545_v27 }
 0x193   : > { %583 = vmatprep.subr.mxu1 %v197_v28 }
 0x194   : > { %584 = vmatpush3.msra.mxu1 %v197_v28 }
 0x195   : > { %585 = vmatprep.subr.mxu1 %v542_v25 }
 0x196   : > { %586 = vmatpush3.msra.mxu1 %v542_v25 }
 0x197   : > { %587 = vmatprep.subr.mxu1 %v187_v26 }
 0x198   : > { %588 = vmatpush3.msra.mxu1 %v187_v26 }
 0x199   : > { %589 = vmatprep.subr.mxu1 %v539_v23 }
 0x19a   : > { %590 = vmatpush3.msra.mxu1 %v539_v23 }
 0x19b   : > { %591 = vmatprep.subr.mxu1 %v177_v24 }
 0x19c   : > { %592 = vmatpush3.msra.mxu1 %v177_v24 }
 0x19d   : > { %594 = vmatmul.mubr.f32.vlgmr.msra.gmra.mxu1 %v746_v1 }
 0x19e   : > { %596 = vmatprep.mubr.f32.mxu1 %v742_v2 }
 0x1a1   : > { %597 = vmatmul.mubr.f32.gmra.mxu1 %v738_v3 }
 0x1a2   : > { %599 = vmatprep.mubr.f32.mxu1 %v734_v4 }
 0x1a5   : > { %600 = vmatmul.mubr.f32.gmra.mxu1 %v730_v5 }
 0x25d   : > { %v595_v40 = vpop.f32.mrf.mxu1 }
 0x25e   : > { %v358_v41 = vmul.f32 0.5, %v595_v40 }
 0x25f   : > { %v322_v43 = vpop.f32.mrf.mxu1 }
 0x260   : > { %v364_v44 = vsub.f32 %v352_v39, %v358_v41  ;;  %v357_v45 = vmul.f32 0.5, %v322_v43 }
 0x261   : > { %v598_v47 = vpop.f32.mrf.mxu1 }
 0x262   : > { %v370_v50 = vsub.f32 %v364_v44, %v746_v1  ;;  %v363_v51 = vsub.f32 %v351_v42, %v357_v45  ;;  %v360_v52 = vmul.f32 0.5, %v598_v47 }
 0x263   : > { %v332_v54 = vpop.f32.mrf.mxu1 }
 0x264   : > { %v369_v55 = vsub.f32 %v363_v51, %v750_v0  ;;  %v366_v56 = vsub.f32 %v354_v46, %v360_v52  ;;  %v359_v57 = vmul.f32 0.5, %v332_v54  ;;  %v400_v60 = vmul.f32 %v480_v49, %v370_v50 }
 0x265   : > { %v601_v59 = vpop.f32.mrf.mxu1  ;;  %v376_v24 = vand.u32 2147483647, %v370_v50 }
 0x266   : > { %v372_v61 = vsub.f32 %v366_v56, %v738_v3  ;;  %v365_v62 = vsub.f32 %v353_v53, %v359_v57  ;;  %v362_v63 = vmul.f32 0.5, %v601_v59  ;;  %v399_v9 = vmul.f32 %v480_v49, %v369_v55 }
 0x267   : > { %v342_v8 = vpop.f32.mrf.mxu1  ;;  %v406_v10 = vadd.f32 %v746_v1, %v400_v60   ;;  %v375_v23 = vand.u32 2147483647, %v369_v55 }
 0x268   : > { %v371_v11 = vsub.f32 %v365_v62, %v742_v2  ;;  %v368_v12 = vsub.f32 %v356_v58, %v362_v63  ;;  %v361_v13 = vmul.f32 0.5, %v342_v8  ;;  %v402_v14 = vmul.f32 %v480_v49, %v372_v61 }
 0x269   : > { %v405_v15 = vadd.f32 %v750_v0, %v399_v9   ;;  %v378_v0 = vand.u32 2147483647, %v372_v61  ;;  %413 = vst [vmem:[%s934_s1 + $0x8] sm:$0xff] (%p19_p0), %v406_v10 }
 0x26a   : > { %v374_v16 = vsub.f32 %v368_v12, %v730_v5  ;;  %v367_v17 = vsub.f32 %v355_v7, %v361_v13  ;;  %v401_v18 = vmul.f32 %v480_v49, %v371_v11  ;;  %v408_v19 = vadd.f32 %v738_v3, %v402_v14  }
 0x26b   : > { %v377_v26 = vand.u32 2147483647, %v371_v11  ;;  %412 = vst [vmem:[%s934_s1] sm:$0xff] (%p19_p0), %v405_v15 }
 0x26c   : > { %v373_v20 = vsub.f32 %v367_v17, %v734_v4  ;;  %v380_v21 = vand.u32 2147483647, %v374_v16  ;;  %v404_v22 = vmul.f32 %v480_v49, %v374_v16  ;;  %v407_v25 = vadd.f32 %v742_v2, %v401_v18   ;;  %415 = vst [vmem:[%s934_s1 + $0x18] sm:$0xff] (%p19_p0), %v408_v19 }
 0x26d   : > { %v384_v3 = vmax.f32.f32 %v377_v26, %v378_v0  ;;  %v942_v0 = vmov %v405_v15 }
 0x26e   : > { %v379_v1 = vand.u32 2147483647, %v373_v20  ;;  %v403_v27 = vmul.f32 %v480_v49, %v373_v20  ;;  %v410_v28 = vadd.f32 %v730_v5, %v404_v22   ;;  %v382_v30 = vmax.f32.f32 %v376_v24, %v380_v21  ;;  %414 = vst [vmem:[%s934_s1 + $0x10] sm:$0xff] (%p19_p0), %v407_v25 }
 0x270   : > { %v381_v29 = vmax.f32.f32 %v375_v23, %v379_v1  ;;  %v409_v31 = vadd.f32 %v734_v4, %v403_v27   ;;  %v937_v5 = vmov %v410_v28  ;;  %v941_v1 = vmov %v406_v10  ;;  %417 = vst [vmem:[%s934_s1 + $0x28] sm:$0xff] (%p19_p0), %v410_v28 }
 0x272   : > { %v383_v32 = vmax.f32.f32 %v381_v29, %v382_v30  ;;  %v938_v4 = vmov %v409_v31  ;;  %416 = vst [vmem:[%s934_s1 + $0x20] sm:$0xff] (%p19_p0), %v409_v31 }
 0x274   : > { %v385_v33 = vmax.f32.f32 %v383_v32, %v384_v3  ;;  %v939_v3 = vmov %v408_v19 }
 0x276   : > { %386 = vmax.xlane.f32.xlu1 %v385_v33 }
 0x2ff   : > { %v387_v34 = vpop.xlane.xlu1 %386 }
 0x300   : > { %v388_v35 = vrot.slane %v387_v34, 4 }
 0x302   : > { %v389_v36 = vmax.f32 %v387_v34, %v388_v35 }
 0x304   : > { %v390_v37 = vrot.slane %v389_v36, 2 }
 0x306   : > { %v391_v38 = vmax.f32 %v389_v36, %v390_v37 }
 0x308   : > { %v392_v2 = vrot.slane %v391_v38, 1 }
 0x30a   : > { %v393_v39 = vmax.f32 %v391_v38, %v392_v2  ;;  %v940_v2 = vmov %v407_v25 }
 0x30c   : > { %602 = vpush %v393_v39 }
 0x33c   :  { %21 = sbr.rel (!%p19_p0) target bundleno = 3 (0x3), region = 39 }
 0x33d   : > { %s603_s0 = spop %602 }
 0x33e   : > { %v395_v40 = vstv %s603_s0 }
 0x33f   : > { %v411_v41 = vsel %vm396_vm1, %v395_v40, %v726_v6  }
 0x340   : > { %v936_v6 = vmov %v411_v41  ;;  %419 = vst.msk [vmem:[#allocation2] sm:$0x1] (%p19_p0), %vm418_vm2, %v411_v41 }
 0x341   :  { %681 = shalt.err (!%p678_p5)
}
 0x342   :  { %431 = dma.vmem_to_hbm [thread:$0]  %s429_s7, 16, %s935_s2, [#allocation3]  }
 0x343   :  { %722 = dma.done.wait [#allocation3], 16  }
 0x344   :  { %723 = vsyncadd [#allocation3], 4294967280 }
 0x345   :  { %437 = vsyncpa [#allocation3], 1 }

</bundles_post_ra>
